<compile_context>
chip_gen: v5e
topology: v5e:2x2
jax: 0.10.0
libtpu: 0.0.40
codegen_flags: <defaults>
</compile_context>

<pallas_src>
import jax
import jax.numpy as jnp
from jax.experimental import pallas as pl
from jax.experimental.pallas import tpu as pltpu

EPS = 1e-5  # nn.LayerNorm default eps


# --------------------------------------------------------------------------- #
# Kernels
# --------------------------------------------------------------------------- #
def _layer_norm_f32(y, g_ref, b_ref):
    """One-pass LayerNorm over the last axis of an f32 accumulator."""
    inv_n = 1.0 / y.shape[-1]
    s1 = jnp.sum(y, axis=-1, keepdims=True)
    s2 = jnp.sum(y * y, axis=-1, keepdims=True)
    mean = s1 * inv_n
    var = jnp.maximum(s2 * inv_n - mean * mean, 0.0)
    inv = jax.lax.rsqrt(var + EPS)                       # EUP slot
    gamma = g_ref[...].astype(jnp.float32)
    beta = b_ref[...].astype(jnp.float32)
    return (y - mean) * inv * gamma + beta


def _fused_gather_kernel(xe_ref, xo_ref, we_ref, wo_ref, g_ref, b_ref, o_ref):
    # xe_ref / xo_ref: (TR, W2, 2C)   even / odd image rows of this tile
    # we_ref / wo_ref: (2C, 2C_out)   column-permuted reduction-weight halves
    # o_ref:           (TR * W2, 2C_out)
    tr, w2, c2 = xe_ref.shape
    # W2 is sublane-aligned on this path, so the collapse is a pure relabeling
    # of the VMEM layout (no data movement).
    xe = xe_ref[...].reshape(tr * w2, c2)
    xo = xo_ref[...].reshape(tr * w2, c2)
    y = jnp.dot(xe, we_ref[...], preferred_element_type=jnp.float32)
    y = y + jnp.dot(xo, wo_ref[...], preferred_element_type=jnp.float32)
    o_ref[...] = _layer_norm_f32(y, g_ref, b_ref).astype(o_ref.dtype)


def _pregathered_kernel(xm_ref, w_ref, g_ref, b_ref, o_ref):
    # xm_ref: (T, 4C) pre-gathered merged tokens, w_ref: (4C, 2C_out)
    y = jnp.dot(xm_ref[...], w_ref[...], preferred_element_type=jnp.float32)
    o_ref[...] = _layer_norm_f32(y, g_ref, b_ref).astype(o_ref.dtype)


# --------------------------------------------------------------------------- #
# Parameter prep (hoisted out of the per-call path)
# --------------------------------------------------------------------------- #
def prepare_patch_merging_params(w_reduction, ln_gamma, ln_beta, dim):
    """w_reduction: (2*dim, 4*dim) torch Linear weight, columns laid out for the
    torch concat order [x0, x1, x2, x3].  Returns (we_t, wo_t, gamma, beta) with
      we_t (2C, 2C_out) acting on the even-image-row pair [x0 | x2],
      wo_t (2C, 2C_out) acting on the odd-image-row pair  [x1 | x3],
    so that  [x0|x2] @ we_t + [x1|x3] @ wo_t == [x0|x1|x2|x3] @ w_reduction.T
    """
    C = dim
    we_t = jnp.concatenate(
        [w_reduction[:, 0:C], w_reduction[:, 2 * C:3 * C]], axis=1).T
    wo_t = jnp.concatenate(
        [w_reduction[:, C:2 * C], w_reduction[:, 3 * C:4 * C]], axis=1).T
    return we_t, wo_t, ln_gamma.reshape(1, -1), ln_beta.reshape(1, -1)


# --------------------------------------------------------------------------- #
# Tiling heuristic
# --------------------------------------------------------------------------- #
def _pick_tile(total_units, tokens_per_unit, bytes_per_token_step,
               resident_bytes=0, target_tokens=1024,
               vmem_budget_bytes=16 * 1024 * 1024):
    """Pick a divisor of `total_units` for the grid: keep the double-buffered
    per-step footprint (plus the resident weight footprint) under the budget
    (sized for v7x's smaller VMEM), keep the token tile sublane-aligned, and
    land near ~1K tokens per step (the measured HBM-roofline sweet spot)."""
    budget = max(vmem_budget_bytes - resident_bytes, 2 * 1024 * 1024)
    best = None
    for d in range(1, total_units + 1):
        if total_units % d:
            continue
        tokens = d * tokens_per_unit
        if tokens % 8 != 0 and d != total_units:
            continue
        if tokens * bytes_per_token_step > budget:
            break
        best = d
        if tokens >= target_tokens:
            break
    return best if best is not None else 1


# --------------------------------------------------------------------------- #
# Forward wrapper
# --------------------------------------------------------------------------- #
def patch_merging(x, input_resolution, we_t, wo_t, gamma, beta, *,
                  row_tile=None, token_tile=None):
    """x: (B, H*W, C)  ->  (B, (H/2)*(W/2), 2C_out)."""
    H, W = input_resolution
    B, L, C = x.shape
    assert L == H * W, "input feature has wrong size"
    assert H % 2 == 0 and W % 2 == 0, f"x size ({H}*{W}) are not even."
    H2, W2 = H // 2, W // 2
    C2 = 2 * C                      # channels per parity row-pair
    Co = we_t.shape[1]              # output channels (= 2*dim)
    R = B * H2
    M = R * W2                      # number of merged tokens

    itemsize = jnp.dtype(x.dtype).itemsize
    sublanes = 8 * max(1, 4 // itemsize)          # f32: 8, bf16: 16, int8: 32
    bytes_per_token_step = 2 * (2 * C2 + Co) * itemsize  # dbl-buffered in + out
    resident_bytes = (2 * C2 * Co + 2 * Co) * itemsize   # weights + LN params

    compiler_params = pltpu.CompilerParams(
        # Independent token tiles -> shard across both TensorCores on v7x.
        dimension_semantics=("parallel",),
        vmem_limit_bytes=32 * 1024 * 1024,
    )
    # Advisory cost so XLA schedules neighbouring ops around the custom call.
    cost = pl.CostEstimate(
        flops=2 * M * (2 * C2) * Co,
        transcendentals=M,
        bytes_accessed=(M * 2 * C2 + M * Co) * itemsize + resident_bytes,
    )
    # NOTE: for the tiny demo Co < 128 lanes -> masked partial stores; real Swin
    # dims (2*dim >= 192) use the (mostly) lane-dense store path.

    if W2 % sublanes == 0:
        # ---- fused-gather path: no HBM round trip for the (M, 4C) tensor.
        # Free, contiguous reshape: row r of xr = one image row pair,
        # [even row | odd row], each as W2 chunks of 2C channels.
        xr = x.reshape(R, 2 * W2, C2)
        if row_tile is None:
            row_tile = _pick_tile(R, W2, bytes_per_token_step, resident_bytes)
        assert R % row_tile == 0, "row_tile must divide B * (H//2)"
        grid = (R // row_tile,)
        out = pl.pallas_call(
            _fused_gather_kernel,
            out_shape=jax.ShapeDtypeStruct((M, Co), x.dtype),
            grid_spec=pltpu.PrefetchScalarGridSpec(
                num_scalar_prefetch=0,
                grid=grid,
                in_specs=[
                    pl.BlockSpec((row_tile, W2, C2), lambda i: (i, 0, 0)),  # even rows
                    pl.BlockSpec((row_tile, W2, C2), lambda i: (i, 1, 0)),  # odd rows
                    pl.BlockSpec((C2, Co), lambda i: (0, 0)),               # resident
                    pl.BlockSpec((C2, Co), lambda i: (0, 0)),               # resident
                    pl.BlockSpec((1, Co), lambda i: (0, 0)),
                    pl.BlockSpec((1, Co), lambda i: (0, 0)),
                ],
                out_specs=pl.BlockSpec((row_tile * W2, Co), lambda i: (i, 0)),
            ),
            compiler_params=compiler_params,
            cost_estimate=cost,
        )(xr, xr, we_t, wo_t, gamma, beta)
    else:
        # ---- fallback: gather in the wrapper (one extra HBM round trip), but
        # the kernel is still tiled/pipelined.  Channel order [even | odd] pair
        # so the same (we_t, wo_t) parameters apply.
        # TODO(synk): fold the gather into the kernel DMA for non-sublane-
        # aligned W//2 too (needs an unaligned sublane relayout / manual DMA).
        xm = x.reshape(R, 2, W2, C2).transpose(0, 2, 1, 3).reshape(M, 2 * C2)
        w_full = jnp.concatenate([we_t, wo_t], axis=0)          # (4C, Co)
        if token_tile is None:
            token_tile = _pick_tile(M, 1, bytes_per_token_step, resident_bytes)
        assert M % token_tile == 0, "token_tile must divide B*(H//2)*(W//2)"
        grid = (M // token_tile,)
        out = pl.pallas_call(
            _pregathered_kernel,
            out_shape=jax.ShapeDtypeStruct((M, Co), x.dtype),
            grid_spec=pltpu.PrefetchScalarGridSpec(
                num_scalar_prefetch=0,
                grid=grid,
                in_specs=[
                    pl.BlockSpec((token_tile, 2 * C2), lambda i: (i, 0)),
                    pl.BlockSpec((2 * C2, Co), lambda i: (0, 0)),           # resident
                    pl.BlockSpec((1, Co), lambda i: (0, 0)),
                    pl.BlockSpec((1, Co), lambda i: (0, 0)),
                ],
                out_specs=pl.BlockSpec((token_tile, Co), lambda i: (i, 0)),
            ),
            compiler_params=compiler_params,
            cost_estimate=cost,
        )(xm, w_full, gamma, beta)

    return out.reshape(B, H2 * W2, Co)


# --------------------------------------------------------------------------- #
# Pure-JAX reference (mirrors the PyTorch forward exactly)
# --------------------------------------------------------------------------- #
def reference(x, input_resolution, w_reduction, ln_gamma, ln_beta):
    H, W = input_resolution
    B, L, C = x.shape
    xv = x.reshape(B, H, W, C)
    x0 = xv[:, 0::2, 0::2, :]
    x1 = xv[:, 1::2, 0::2, :]
    x2 = xv[:, 0::2, 1::2, :]
    x3 = xv[:, 1::2, 1::2, :]
    xm = jnp.concatenate([x0, x1, x2, x3], -1).reshape(B, -1, 4 * C)
    y = jnp.einsum("blk,ok->blo", xm, w_reduction)
    mean = jnp.mean(y, axis=-1, keepdims=True)
    var = jnp.mean((y - mean) ** 2, axis=-1, keepdims=True)
    yn = (y - mean) / jnp.sqrt(var + EPS)
    return yn * ln_gamma + ln_beta


# --------------------------------------------------------------------------- #
# Demo / correctness check
# --------------------------------------------------------------------------- #
if __name__ == "__main__":
    key = jax.random.PRNGKey(0)

    def run_case(B, H, W, dim, **tiles):
        k = jax.random.fold_in(key, H * 1000 + W * 10 + dim)
        k_x, k_w, k_g, k_b = jax.random.split(k, 4)
        x = jax.random.normal(k_x, (B, H * W, dim), dtype=jnp.float32)
        # nn.Linear(4*dim, 2*dim, bias=False) weight layout: (2*dim, 4*dim)
        w_reduction = jax.random.normal(k_w, (2 * dim, 4 * dim), jnp.float32) * 0.02
        ln_gamma = 1.0 + 0.1 * jax.random.normal(k_g, (2 * dim,), jnp.float32)
        ln_beta = 0.1 * jax.random.normal(k_b, (2 * dim,), jnp.float32)

        we_t, wo_t, gamma, beta = prepare_patch_merging_params(
            w_reduction, ln_gamma, ln_beta, dim)
        out = patch_merging(x, (H, W), we_t, wo_t, gamma, beta, **tiles)
        out = jax.block_until_ready(out)

        ref = reference(x, (H, W), w_reduction, ln_gamma, ln_beta)
        assert out.shape == (B, (H // 2) * (W // 2), 2 * dim)
        err = float(jnp.max(jnp.abs(out - ref)))
        assert jnp.allclose(out, ref, atol=1e-4, rtol=1e-4), err

    # Fused-gather path (W//2 = 8 is sublane-aligned): 4-step pipelined grid.
    run_case(2, 16, 16, 32, row_tile=4)
    # Fused-gather path with automatic tile selection.
    run_case(2, 32, 32, 32)
    # Fallback path (W//2 = 4 not sublane-aligned): wrapper gather, 4-step grid.
    run_case(2, 8, 8, 16, token_tile=8)

    print("KERNEL_OK")
</pallas_src>

<mosaic_0001>
module attributes {stable_mosaic.version = 11 : i64} {
  func.func @_fused_gather_kernel(%arg0: i32, %arg1: memref<4x8x64xf32, #tpu.memory_space<vmem>>, %arg2: memref<4x8x64xf32, #tpu.memory_space<vmem>>, %arg3: memref<64x64xf32, #tpu.memory_space<vmem>>, %arg4: memref<64x64xf32, #tpu.memory_space<vmem>>, %arg5: memref<1x64xf32, #tpu.memory_space<vmem>>, %arg6: memref<1x64xf32, #tpu.memory_space<vmem>>, %arg7: memref<32x64xf32, #tpu.memory_space<vmem>>) attributes {dimension_semantics = [#tpu.dimension_semantics<parallel>], iteration_bounds = array<i64: 4>, scalar_prefetch = 0 : i64, scratch_operands = 0 : i64, tpu.core_type = #tpu.core_type<tc>, window_params = [{transform_indices = @transform_0, window_bounds = array<i64: 4, 8, 64>}, {transform_indices = @transform_1, window_bounds = array<i64: 4, 8, 64>}, {pipeline_mode = #tpu.pipeline_mode<synchronous>, transform_indices = @transform_2, window_bounds = array<i64: 64, 64>}, {pipeline_mode = #tpu.pipeline_mode<synchronous>, transform_indices = @transform_3, window_bounds = array<i64: 64, 64>}, {pipeline_mode = #tpu.pipeline_mode<synchronous>, transform_indices = @transform_4, window_bounds = array<i64: 1, 64>}, {pipeline_mode = #tpu.pipeline_mode<synchronous>, transform_indices = @transform_5, window_bounds = array<i64: 1, 64>}, {transform_indices = @transform_6, window_bounds = array<i64: 32, 64>}]} {
    %c0 = arith.constant 0 : index
    %c0_0 = arith.constant 0 : index
    %c0_1 = arith.constant 0 : index
    %0 = vector.load %arg1[%c0, %c0_0, %c0_1] : memref<4x8x64xf32, #tpu.memory_space<vmem>>, vector<4x8x64xf32>
    %1 = vector.shape_cast %0 : vector<4x8x64xf32> to vector<32x64xf32>
    %c0_2 = arith.constant 0 : index
    %c0_3 = arith.constant 0 : index
    %c0_4 = arith.constant 0 : index
    %2 = vector.load %arg2[%c0_2, %c0_3, %c0_4] : memref<4x8x64xf32, #tpu.memory_space<vmem>>, vector<4x8x64xf32>
    %3 = vector.shape_cast %2 : vector<4x8x64xf32> to vector<32x64xf32>
    %c0_5 = arith.constant 0 : index
    %c0_6 = arith.constant 0 : index
    %4 = vector.load %arg3[%c0_5, %c0_6] : memref<64x64xf32, #tpu.memory_space<vmem>>, vector<64x64xf32>
    %cst = arith.constant dense<0.000000e+00> : vector<32x64xf32>
    %5 = tpu.matmul %1, %4, %cst {dimension_numbers = #tpu.dot_dimension_numbers<[1], [0], [0], [1], [0, 0, 1, 1], [], []>} : vector<32x64xf32>, vector<64x64xf32>, vector<32x64xf32> -> vector<32x64xf32>
    %c0_7 = arith.constant 0 : index
    %c0_8 = arith.constant 0 : index
    %6 = vector.load %arg4[%c0_7, %c0_8] : memref<64x64xf32, #tpu.memory_space<vmem>>, vector<64x64xf32>
    %cst_9 = arith.constant dense<0.000000e+00> : vector<32x64xf32>
    %7 = tpu.matmul %3, %6, %cst_9 {dimension_numbers = #tpu.dot_dimension_numbers<[1], [0], [0], [1], [0, 0, 1, 1], [], []>} : vector<32x64xf32>, vector<64x64xf32>, vector<32x64xf32> -> vector<32x64xf32>
    %8 = arith.addf %5, %7 : vector<32x64xf32>
    %cst_10 = arith.constant dense<0.000000e+00> : vector<32xf32>
    %9 = vector.multi_reduction <add>, %8, %cst_10 [1] : vector<32x64xf32> to vector<32xf32>
    %10 = vector.shape_cast %9 : vector<32xf32> to vector<32x1xf32>
    %11 = arith.mulf %8, %8 : vector<32x64xf32>
    %cst_11 = arith.constant dense<0.000000e+00> : vector<32xf32>
    %12 = vector.multi_reduction <add>, %11, %cst_11 [1] : vector<32x64xf32> to vector<32xf32>
    %13 = vector.shape_cast %12 : vector<32xf32> to vector<32x1xf32>
    %cst_12 = arith.constant 1.562500e-02 : f32
    %14 = vector.broadcast %cst_12 : f32 to vector<32x1xf32>
    %15 = arith.mulf %10, %14 : vector<32x1xf32>
    %cst_13 = arith.constant 1.562500e-02 : f32
    %16 = vector.broadcast %cst_13 : f32 to vector<32x1xf32>
    %17 = arith.mulf %13, %16 : vector<32x1xf32>
    %18 = arith.mulf %15, %15 : vector<32x1xf32>
    %19 = arith.subf %17, %18 : vector<32x1xf32>
    %cst_14 = arith.constant 0.000000e+00 : f32
    %20 = vector.broadcast %cst_14 : f32 to vector<32x1xf32>
    %21 = arith.maximumf %19, %20 : vector<32x1xf32>
    %cst_15 = arith.constant 9.99999974E-6 : f32
    %22 = vector.broadcast %cst_15 : f32 to vector<32x1xf32>
    %23 = arith.addf %21, %22 : vector<32x1xf32>
    %24 = math.rsqrt %23 : vector<32x1xf32>
    %c0_16 = arith.constant 0 : index
    %c0_17 = arith.constant 0 : index
    %25 = vector.load %arg5[%c0_16, %c0_17] : memref<1x64xf32, #tpu.memory_space<vmem>>, vector<1x64xf32>
    %c0_18 = arith.constant 0 : index
    %c0_19 = arith.constant 0 : index
    %26 = vector.load %arg6[%c0_18, %c0_19] : memref<1x64xf32, #tpu.memory_space<vmem>>, vector<1x64xf32>
    %27 = vector.broadcast %15 : vector<32x1xf32> to vector<32x64xf32>
    %28 = arith.subf %8, %27 : vector<32x64xf32>
    %29 = vector.broadcast %24 : vector<32x1xf32> to vector<32x64xf32>
    %30 = arith.mulf %28, %29 : vector<32x64xf32>
    %31 = vector.broadcast %25 : vector<1x64xf32> to vector<32x64xf32>
    %32 = arith.mulf %30, %31 : vector<32x64xf32>
    %33 = vector.broadcast %26 : vector<1x64xf32> to vector<32x64xf32>
    %34 = arith.addf %32, %33 : vector<32x64xf32>
    %c0_20 = arith.constant 0 : index
    %c0_21 = arith.constant 0 : index
    %35 = vector.load %arg7[%c0_20, %c0_21] : memref<32x64xf32, #tpu.memory_space<vmem>>, vector<32x64xf32>
    tpu.vector_store %arg7[%c0_20, %c0_21], %34 {strides = array<i32>} : memref<32x64xf32, #tpu.memory_space<vmem>>, vector<32x64xf32>,
    return
  }
  func.func @transform_0(%arg0: i32) -> (i32, i32, i32) {
    %c0_i32 = arith.constant 0 : i32
    %c0_i32_0 = arith.constant 0 : i32
    %c0_i32_1 = arith.constant 0 : i32
    return %arg0, %c0_i32, %c0_i32_0 : i32, i32, i32
  }
  func.func @transform_1(%arg0: i32) -> (i32, i32, i32) {
    %c1_i32 = arith.constant 1 : i32
    %c0_i32 = arith.constant 0 : i32
    %c0_i32_0 = arith.constant 0 : i32
    return %arg0, %c1_i32, %c0_i32 : i32, i32, i32
  }
  func.func @transform_2(%arg0: i32) -> (i32, i32) {
    %c0_i32 = arith.constant 0 : i32
    %c0_i32_0 = arith.constant 0 : i32
    %c0_i32_1 = arith.constant 0 : i32
    return %c0_i32, %c0_i32_0 : i32, i32
  }
  func.func @transform_3(%arg0: i32) -> (i32, i32) {
    %c0_i32 = arith.constant 0 : i32
    %c0_i32_0 = arith.constant 0 : i32
    %c0_i32_1 = arith.constant 0 : i32
    return %c0_i32, %c0_i32_0 : i32, i32
  }
  func.func @transform_4(%arg0: i32) -> (i32, i32) {
    %c0_i32 = arith.constant 0 : i32
    %c0_i32_0 = arith.constant 0 : i32
    %c0_i32_1 = arith.constant 0 : i32
    return %c0_i32, %c0_i32_0 : i32, i32
  }
  func.func @transform_5(%arg0: i32) -> (i32, i32) {
    %c0_i32 = arith.constant 0 : i32
    %c0_i32_0 = arith.constant 0 : i32
    %c0_i32_1 = arith.constant 0 : i32
    return %c0_i32, %c0_i32_0 : i32, i32
  }
  func.func @transform_6(%arg0: i32) -> (i32, i32) {
    %c0_i32 = arith.constant 0 : i32
    %c0_i32_0 = arith.constant 0 : i32
    return %arg0, %c0_i32 : i32, i32
  }
}

</mosaic_0001>

<bundles_post_ra>
// kernel: tpu_custom_call.1
= control target key start
LH: loop header
LB: loop body
LE: loop exit
PB: predicated region body
PF: predicated region fallthrough
CT: control target
= control target key end

     0   :  { %s1257_s0 = inlined_call_operand.hbm [shape: f32[16,16,64], index: 0, kind: input, shape index: {}]   ;;  %s1258_s1 = inlined_call_operand.hbm [shape: f32[16,16,64], index: 1, kind: input, shape index: {}]   ;;  %s1259_s2 = inlined_call_operand.hbm [shape: f32[64,64], index: 2, kind: input, shape index: {}]   ;;  %s1260_s3 = inlined_call_operand.hbm [shape: f32[64,64], index: 3, kind: input, shape index: {}]   ;;  %s1261_s4 = inlined_call_operand.vmem [shape: f32[1,64], index: 4, kind: input, shape index: {}]   ;;  %s1262_s5 = inlined_call_operand.vmem [shape: f32[1,64], index: 5, kind: input, shape index: {}]   ;;  %s1263_s6 = inlined_call_operand.vmem [shape: f32[128,64], index: 6, kind: output, shape index: {}]  }
   0x1   :  { %1268 = sst [smem:[#allocation13_spill]] %s1257_s0 }
   0x2   :  { %1269 = sst [smem:[#allocation14_spill]] %s1259_s2 }
   0x3   :  { %1270 = sst [smem:[#allocation15_spill]] %s1260_s3 }
   0x4   :  { %11 = vsyncpa [#allocation3], 0 }
   0x5   :  { %13 = vsyncpa [#allocation3 + $0x1], 0 }
   0x6   :  { %14 = vsyncpa [#allocation5], 0 }
   0x7   :  { %16 = vsyncpa [#allocation5 + $0x1], 0 }
   0x8   :  { %17 = vsyncpa [#allocation8], 0  ;;  %s1028_s21 = smov 0   ;;  %s1030_s22 = smov 0  }
   0x9   :  { %s1032_s23 = smov 0   ;;  %s1034_s24 = smov 0  }
   0xa LB: > { %s1047_s25 = sadd.s32 4294967295, %s986_s24   ;;  %p43_p0 = scmp.ne.s32.totalorder %s978_s22, %s974_s21  ;;  %s986_s24 = sphi %s1034_s24, %s1282_s24   ;;  %s982_s23 = sphi %s1032_s23, %s1281_s23   ;;  %s978_s22 = sphi %s1030_s22, %s1280_s22   ;;  %s974_s21 = sphi %s1028_s21, %s1279_s21  }
   0xb   : > { %p44_p1 = scmp.eq.s32.totalorder %s1047_s25, 0  ;;  %p695_p2 = scmp.ge.s32.totalorder %s986_s24, 1 }
   0xc   : > { %p190_p3 = scmp.lt.s32.totalorder %s986_s24, 5  ;;  %s1272_s2 = sld [smem:[#allocation14_spill]] }
   0xd   : > { %p1055_p4 = por %p44_p1, %p43_p0  ;;  %s988_s7 = smov [#allocation6]  }
   0xe   : > { %p1062_p5 = pnand %p695_p2, %p190_p3  ;;  %s203_s8 = sshll.u32 %s988_s7, 4  ;;  %s204_s8 = int_to_ptr.vmem [resolvable:$true] %s203_s8 }
   0xf   : > { %s1274_s3 = sld [smem:[#allocation15_spill]]  ;;  %s1264_s12 = smov 128  }
  0x10   : > { %p754_p6 = pneg %p1062_p5  ;;  %s1266_s13 = smov 8  }
  0x11   : > { %s991_s14 = smov [#allocation7]   ;;  %s1080_s16 = sadd.s32 1, %s986_s24  }
  0x12   : > { %s201_s29 = sshll.u32 %s1272_s2, 4  ;;  %p755_p7 = pnand %p754_p6, %p44_p1  ;;  %s202_s29 = int_to_ptr.hbm [resolvable:$true] %s201_s29 }
  0x13   : > { %s217_s15 = sshll.u32 %s991_s14, 4  ;;  %s30_s17 = sadd.s32 1, %s982_s23  ;;  %s218_s15 = int_to_ptr.vmem [resolvable:$true] %s217_s15 }
  0x14   : > { %757 = dma.hbm_to_vmem [thread:$0]  (!%p755_p7), %s202_s29, 1024, %s204_s8, [#allocation5], %s1264_s12, %s1264_s12, %s1266_s13  }
  0x15   : > { %s215_s11 = sshll.u32 %s1274_s3, 4  ;;  %s27_s18 = ssub.s32 %s986_s24, %s1080_s16  ;;  %s216_s11 = int_to_ptr.hbm [resolvable:$true] %s215_s11 }
  0x16   : > { %760 = dma.hbm_to_vmem [thread:$0]  (!%p755_p7), %s216_s11, 1024, %s218_s15, [#allocation8], %s1264_s12, %s1264_s12, %s1266_s13  }
  0x17   : > { %p37_p8 = scmp.ne.s32.totalorder %s982_s23, %s978_s22  ;;  %p28_p9 = scmp.eq.s32.totalorder %s27_s18, 0 }
  0x18   : > { %p38_p10 = scmp.eq.s32.totalorder %s986_s24, 0  ;;  %p770_p11 = scmp.lt.s32.totalorder %s986_s24, 4 }
  0x19   : > { %s237_s19 = sand.u32 1, %s982_s23   ;;  %s724_s27 = sshll.u32 %s986_s24, 6 }
  0x1a   : > { %s1091_s20 = scalar_select %p28_p9, %s982_s23, %s30_s17  }
  0x1b   : > { %p39_p12 = por %p38_p10, %p37_p8  ;;  %s1093_s21 = sshll.u32 %s237_s19, 5 }
  0x1c   : > { %s1275_s0 = sld [smem:[#allocation13_spill]]  ;;  %s241_s9 = scalar_lea.vmem [#allocation2], %s1093_s21 }
  0x1d   : > { %s250_s10 = sshll.u32 %s241_s9, 4  ;;  %p1100_p13 = pnand %p770_p11, %p39_p12  ;;  %s251_s10 = int_to_ptr.vmem [resolvable:$true] %s250_s10 }
  0x1e   : > { %s621_s17 = scalar_lea.hbm %s1258_s1, %s724_s27  ;;  %s238_s12 = scalar_lea.sflag [#allocation3], %s237_s19 }
  0x1f   : > { %s622_s18 = scalar_lea.hbm %s621_s17, 8  ;;  %p884_p2 = pneg %p1100_p13 }
  0x22   : > { %s247_s7 = scalar_lea.hbm %s1275_s0, %s724_s27  ;;  %s887_s9 = scalar_lea.hbm %s1275_s0, 256 }
  0x23   : > { %s248_s8 = sshll.u32 %s247_s7, 4  ;;  %s249_s8 = int_to_ptr.hbm [resolvable:$true] %s248_s8 }
  0x24   : > { %s880_s13 = sshra.s32 %s249_s8, 4  ;;  %s881_s13 = int_to_ptr.hbm [resolvable:$true] %s880_s13 }
  0x25   : > { %s882_s28 = scalar_lea.hbm %s881_s13, 32  ;;  %p888_p7 = scmp.lt.s32.totalorder %s881_s13, %s1275_s0 }
  0x26   : > { %p883_p0 = scmp.ne.s32.totalorder %s881_s13, %s882_s28  ;;  %p889_p8 = scmp.lt.s32.totalorder %s887_s9, %s882_s28 }
  0x28   : > { %p885_p3 = pnand %p884_p2, %p883_p0  ;;  %p890_p9 = por %p889_p8, %p888_p7 }
  0x2a   : > { %p886_p6 = pneg %p885_p3 }
  0x2c   : > { %p891_p10 = pnand %p890_p9, %p886_p6 }
  0x2e   : > { %894 = shalt.err (!%p891_p10)
}
  0x2f   : > { %s992_s19 = smov 256   ;;  %s1277_s27 = smov 8  }
  0x30   : > { %s1278_s17 = smov 128   ;;  %s272_s2 = sshll.u32 %s622_s18, 4  ;;  %s273_s2 = int_to_ptr.hbm [resolvable:$true] %s272_s2 }
  0x31   : > { %764 = dma.hbm_to_vmem [thread:$0]  (!%p1100_p13), %s249_s8, 512, %s251_s10, %s238_s12, %s992_s19, %s1278_s17, %s1277_s27  }
  0x32   : > { %s264_s29 = scalar_lea.vmem [#allocation4], %s1093_s21  ;;  %s260_s14 = sand.u32 1, %s986_s24  }
  0x33   : > { %s274_s7 = sshll.u32 %s264_s29, 4  ;;  %s261_s13 = scalar_lea.sflag [#allocation5], %s260_s14  ;;  %s275_s7 = int_to_ptr.vmem [resolvable:$true] %s274_s7 }
  0x34   : > { %s910_s28 = sshra.s32 %s273_s2, 4  ;;  %s917_s3 = scalar_lea.hbm %s1258_s1, 256  ;;  %s911_s28 = int_to_ptr.hbm [resolvable:$true] %s910_s28 }
  0x35   : > { %s912_s9 = scalar_lea.hbm %s911_s28, 32  ;;  %p918_p3 = scmp.lt.s32.totalorder %s911_s28, %s1258_s1 }
  0x36   : > { %p913_p11 = scmp.ne.s32.totalorder %s911_s28, %s912_s9  ;;  %p919_p6 = scmp.lt.s32.totalorder %s917_s3, %s912_s9 }
  0x38   : > { %p915_p12 = pnand %p913_p11, %p884_p2  ;;  %p920_p7 = por %p919_p6, %p918_p3 }
  0x3a   : > { %p916_p0 = pneg %p915_p12 }
  0x3c   : > { %p921_p8 = pnand %p920_p7, %p916_p0 }
  0x3e   : > { %924 = shalt.err (!%p921_p8)
}
  0x3f   : > { %767 = dma.hbm_to_vmem [thread:$0]  (!%p1100_p13), %s273_s2, 512, %s275_s7, %s261_s13, %s992_s19, %s1278_s17, %s1277_s27  }
  0x40   : > { %286 = sbr.rel (%p1062_p5) target bundleno = 395 (0x18b), region = 44  ;;  %s288_s0 = sand.u32 (!%p1062_p5), 1, %s978_s22  }
  0x41   : > { %s707_s24 = sshll.u32 (!%p1062_p5), %s288_s0, 5  ;;  %s289_s21 = scalar_lea.sflag (!%p1062_p5), [#allocation3], %s288_s0 }
  0x42   : > { %s1140_s10 = scalar_lea.vmem (!%p1062_p5), [#allocation2], %s707_s24 }
  0x45   : > { %957 = dma.done.wait (%p1055_p4), %s289_s21, 512  }
  0x46   : > { %959 = vsyncadd (%p1055_p4), %s289_s21, 4294966784  ;;  %s298_s3 = sand.u32 1, %s1047_s25   ;;  %s1147_s2 = scalar_lea.vmem [#allocation4], %s707_s24 }
  0x47   : > { %s299_s11 = scalar_lea.sflag [#allocation5], %s298_s3 }
  0x48   : > { %961 = dma.done.wait (%p1055_p4), %s299_s11, 512  }
  0x49   : > { %963 = vsyncadd (%p1055_p4), %s299_s11, 4294966784 }
  0x4a   : > { %965 = dma.done.wait (%p44_p1), [#allocation5], 1024  }
  0x4b   : > { %967 = vsyncadd (%p44_p1), [#allocation5], 4294966272 }
  0x4c   : > { %969 = dma.done.wait (%p44_p1), [#allocation8], 1024  }
  0x4d   : > { %971 = vsyncadd (%p44_p1), [#allocation8], 4294966272  ;;  %v378_v0 = vld [vmem:[#allocation7 + $0x38] sm:$0xff]  ;;  %v377_v2 = vld [vmem:[#allocation7 + $0x30] sm:$0xff]  ;;  %vm379_vm0 = vcmask 523264   ;;  %s711_s26 = sshll.u32 %s1047_s25, 2 }
  0x4e   : > { %v370_v1 = vld [vmem:[#allocation6 + $0x38] sm:$0xff]  ;;  %400 = vmatpush.msra.mxu0 %v378_v0  ;;  %726 = vmatpush.msra.mxu2 %v378_v0  ;;  %v369_v3 = vld [vmem:[#allocation6 + $0x30] sm:$0xff]  ;;  %v376_v4 = vld [vmem:[#allocation7 + $0x28] sm:$0xff]  ;;  %p350_p1 = scmp.lt.s32.totalorder %s711_s26, 15 }
  0x4f   : > { %441 = vmatpush.msra.mxu1 %v370_v1  ;;  %734 = vmatpush.msra.mxu3 %v370_v1  ;;  %v368_v5 = vld [vmem:[#allocation6 + $0x28] sm:$0xff]  ;;  %v375_v6 = vld [vmem:[#allocation7 + $0x20] sm:$0xff]  ;;  %v374_v8 = vld [vmem:[#allocation7 + $0x18] sm:$0xff] }
  0x50   : > { %401 = vmatpush.msra.mxu0 %v377_v2  ;;  %727 = vmatpush.msra.mxu2 %v377_v2  ;;  %v367_v7 = vld [vmem:[#allocation6 + $0x20] sm:$0xff]  ;;  %v366_v9 = vld [vmem:[#allocation6 + $0x18] sm:$0xff]  ;;  %v373_v10 = vld [vmem:[#allocation7 + $0x10] sm:$0xff]  ;;  %s1284_s26 = smov (!%p350_p1, %s711_s26), 15 }
  0x51   : > { %442 = vmatpush.msra.mxu1 %v369_v3  ;;  %735 = vmatpush.msra.mxu3 %v369_v3  ;;  %v365_v11 = vld [vmem:[#allocation6 + $0x10] sm:$0xff]  ;;  %v372_v12 = vld [vmem:[#allocation7 + $0x8] sm:$0xff]  ;;  %v371_v14 = vld [vmem:[#allocation7] sm:$0xff]  ;;  %s712_s18 = sshll.u32 %s1284_s26, 3 }
  0x52   : > { %402 = vmatpush.msra.mxu0 %v376_v4  ;;  %728 = vmatpush.msra.mxu2 %v376_v4  ;;  %v364_v13 = vld [vmem:[#allocation6 + $0x8] sm:$0xff]  ;;  %v363_v15 = vld [vmem:[#allocation6] sm:$0xff]  ;;  %v361_v17 = vld [vmem:[%s1147_s2 + $0x10] sm:$0xff]  ;;  %s1228_s7 = scalar_lea.vmem %s1263_s6, %s712_s18 }
  0x53   : > { %443 = vmatpush.msra.mxu1 %v368_v5  ;;  %736 = vmatpush.msra.mxu3 %v368_v5  ;;  %v359_v16 = vld [vmem:[%s1147_s2] sm:$0xff]  ;;  %v357_v19 = vld [vmem:[%s1140_s10 + $0x10] sm:$0xff]  ;;  %v360_v20 = vld [vmem:[%s1147_s2 + $0x8] sm:$0xff] }
  0x54   : > { %403 = vmatpush.msra.mxu0 %v375_v6  ;;  %729 = vmatpush.msra.mxu2 %v375_v6  ;;  %v355_v18 = vld [vmem:[%s1140_s10] sm:$0xff]  ;;  %v362_v21 = vld [vmem:[%s1147_s2 + $0x18] sm:$0xff]  ;;  %v356_v22 = vld [vmem:[%s1140_s10 + $0x8] sm:$0xff] }
  0x55   : > { %444 = vmatpush.msra.mxu1 %v367_v7  ;;  %737 = vmatpush.msra.mxu3 %v367_v7  ;;  %v358_v23 = vld [vmem:[%s1140_s10 + $0x18] sm:$0xff] }
  0x56   : > { %404 = vmatpush.msra.mxu0 %v374_v8  ;;  %730 = vmatpush.msra.mxu2 %v374_v8 }
  0x57   : > { %445 = vmatpush.msra.mxu1 %v366_v9  ;;  %738 = vmatpush.msra.mxu3 %v366_v9 }
  0x58   : > { %405 = vmatpush.msra.mxu0 %v373_v10  ;;  %731 = vmatpush.msra.mxu2 %v373_v10 }
  0x59   : > { %446 = vmatpush.msra.mxu1 %v365_v11  ;;  %739 = vmatpush.msra.mxu3 %v365_v11 }
  0x5a   : > { %406 = vmatpush.msra.mxu0 %v372_v12  ;;  %732 = vmatpush.msra.mxu2 %v372_v12 }
  0x5b   : > { %447 = vmatpush.msra.mxu1 %v364_v13  ;;  %740 = vmatpush.msra.mxu3 %v364_v13 }
  0x5c   : > { %407 = vmatpush.msra.mxu0 %v371_v14  ;;  %733 = vmatpush.msra.mxu2 %v371_v14 }
  0x5d   : > { %448 = vmatpush.msra.mxu1 %v363_v15  ;;  %741 = vmatpush.msra.mxu3 %v363_v15 }
  0x5e   : > { %713 = vmatmul.msk.f32.vlgmr.msra.gmra.mxu0 %vm379_vm0, %v359_v16  ;;  %715 = vmatmul.msk.f32.vlgmr.msra.gmra.mxu2 %vm379_vm0, %v361_v17 }
  0x5f   : > { %717 = vmatmul.msk.f32.vlgmr.msra.gmra.mxu1 %vm379_vm0, %v355_v18  ;;  %719 = vmatmul.msk.f32.vlgmr.msra.gmra.mxu3 %vm379_vm0, %v357_v19 }
  0x66   : > { %714 = vmatmul.msk.f32.gmra.mxu0 %vm379_vm0, %v360_v20  ;;  %716 = vmatmul.msk.f32.gmra.mxu2 %vm379_vm0, %v362_v21 }
  0x67   : > { %718 = vmatmul.msk.f32.gmra.mxu1 %vm379_vm0, %v356_v22  ;;  %720 = vmatmul.msk.f32.gmra.mxu3 %vm379_vm0, %v358_v23  ;;  %v810_v22 = vld [vmem:[%s1261_s4] ss:$0 sm:$0xff] }
  0xdb   : > { %v409_v24 = vpop.f32.mrf.mxu0 }
  0xdc   : > { %v450_v25 = vpop.f32.mrf.mxu1 }
  0xdd   : > { %v1177_v26 = vadd.f32 %v450_v25, %v409_v24 }
  0xdf   : > { %v462_v27 = vsel %vm379_vm0, %v1177_v26, 0.0  ;;  %v474_v28 = vmul.f32 %v1177_v26, %v1177_v26 }
  0xe0   : > { %463 = vadd.xlane.f32.xlu0 %v462_v27  ;;  %v811_v27 = vld [vmem:[%s1262_s5] ss:$0 sm:$0xff] }
  0xe1   : > { %v415_v29 = vpop.f32.mrf.mxu2  ;;  %v478_v30 = vsel %vm379_vm0, %v474_v28, 0.0 }
  0xe2   : > { %v456_v31 = vpop.f32.mrf.mxu3  ;;  %479 = vadd.xlane.f32.xlu2 %v478_v30 }
  0xe3   : > { %v1184_v32 = vadd.f32 %v456_v31, %v415_v29  ;;  %v412_v33 = vpop.f32.mrf.mxu0 }
  0xe4   : > { %v453_v34 = vpop.f32.mrf.mxu1 }
  0xe5   : > { %v1186_v35 = vadd.f32 %v453_v34, %v412_v33  ;;  %v468_v36 = vsel %vm379_vm0, %v1184_v32, 0.0  ;;  %v476_v43 = vmul.f32 %v1184_v32, %v1184_v32 }
  0xe6   : > { %469 = vadd.xlane.f32.xlu1 %v468_v36 }
  0xe7   : > { %v465_v37 = vsel %vm379_vm0, %v1186_v35, 0.0  ;;  %v475_v38 = vmul.f32 %v1186_v35, %v1186_v35  ;;  %v484_v45 = vsel %vm379_vm0, %v476_v43, 0.0 }
  0xe8   : > { %466 = vadd.xlane.f32.xlu0 %v465_v37 }
  0xe9   : > { %v418_v39 = vpop.f32.mrf.mxu2  ;;  %v481_v40 = vsel %vm379_vm0, %v475_v38, 0.0 }
  0xea   : > { %v459_v41 = vpop.f32.mrf.mxu3  ;;  %482 = vadd.xlane.f32.xlu2 %v481_v40 }
  0xeb   : > { %v1195_v42 = vadd.f32 %v459_v41, %v418_v39 }
  0xed   : > { %v471_v44 = vsel %vm379_vm0, %v1195_v42, 0.0  ;;  %v477_v46 = vmul.f32 %v1195_v42, %v1195_v42 }
  0xee   : > { %472 = vadd.xlane.f32.xlu1 %v471_v44 }
  0xef   : > { %v487_v47 = vsel %vm379_vm0, %v477_v46, 0.0 }
  0xf0   : > { %485 = vadd.xlane.f32.xlu0 %v484_v45 }
  0xf6   : > { %488 = vadd.xlane.f32.xlu1 %v487_v47 }
 0x153   : > { %v464_v48 = vpop.xlane.xlu0 %463 }
 0x154   : > { %v490_v49 = vmul.f32 0.015625, %v464_v48 }
 0x155   : > { %v480_v50 = vpop.xlane.xlu2 %479 }
 0x156   : > { %v498_v51 = vmul.f32 %v490_v49, %v490_v49  ;;  %v494_v52 = vmul.f32 0.015625, %v480_v50  ;;  %v556_v21 = vsub.f32 %v1177_v26, %v490_v49 }
 0x158   : > { %v502_v53 = vsub.f32 %v494_v52, %v498_v51 }
 0x159   : > { %v470_v54 = vpop.xlane.xlu1 %469 }
 0x15a   : > { %v506_v55 = vmax.f32 %v502_v53, 0.0  ;;  %v1209_v62 = vmul.f32 0.015625, %v470_v54 }
 0x15b   : > { %v467_v56 = vpop.xlane.xlu0 %466 }
 0x15c   : > { %v510_v57 = vadd.f32 1e-05, %v506_v55  ;;  %v1205_v58 = vmul.f32 0.015625, %v467_v56  ;;  %v500_v4 = vmul.f32 %v1209_v62, %v1209_v62  ;;  %v558_v51 = vsub.f32 %v1184_v32, %v1209_v62 }
 0x15d   : > { %v483_v59 = vpop.xlane.xlu2 %482 }
 0x15e   : > { %812 = vrsqrt.f32 %v510_v57  ;;  %v499_v60 = vmul.f32 %v1205_v58, %v1205_v58  ;;  %v495_v61 = vmul.f32 0.015625, %v483_v59  ;;  %vm520_vm1 = vweird.f32 %v510_v57 }
 0x15f   : > { %v557_v40 = vsub.f32 %v1186_v35, %v1205_v58 }
 0x160   : > { %v503_v63 = vsub.f32 %v495_v61, %v499_v60 }
 0x161   : > { %v473_v0 = vpop.xlane.xlu1 %472 }
 0x162   : > { %v507_v1 = vmax.f32 %v503_v63, 0.0  ;;  %v1214_v8 = vmul.f32 0.015625, %v473_v0 }
 0x163   : > { %v486_v2 = vpop.xlane.xlu0 %485 }
 0x164   : > { %v813_v3 = vpop.eup %812  ;;  %v496_v5 = vmul.f32 0.015625, %v486_v2  ;;  %v511_v7 = vadd.f32 1e-05, %v507_v1  ;;  %v501_v14 = vmul.f32 %v1214_v8, %v1214_v8  ;;  %v559_v58 = vsub.f32 %v1195_v42, %v1214_v8 }
 0x165   : > { %v515_v6 = vmul.f32 %v813_v3, %v510_v57  ;;  %vm521_vm2 = vweird.f32 %v813_v3 }
 0x166   : > { %v504_v9 = vsub.f32 %v496_v5, %v500_v4  ;;  %814 = vrsqrt.f32 %v511_v7  ;;  %vm522_vm3 = vmor %vm520_vm1, %vm521_vm2  ;;  %vm530_vm4 = vweird.f32 %v511_v7 }
 0x167   : > { %v516_v10 = vmul.f32 %v813_v3, %v515_v6 }
 0x168   : > { %v508_v11 = vmax.f32 %v504_v9, 0.0 }
 0x169   : > { %v517_v12 = vmul.f32 0.5, %v516_v10  ;;  %v489_v13 = vpop.xlane.xlu1 %488 }
 0x16a   : > { %v512_v15 = vadd.f32 1e-05, %v508_v11  ;;  %v497_v16 = vmul.f32 0.015625, %v489_v13 }
 0x16b   : > { %v518_v17 = vsub.f32 1.5, %v517_v12 }
 0x16c   : > { %816 = vrsqrt.f32 %v512_v15  ;;  %v505_v18 = vsub.f32 %v497_v16, %v501_v14  ;;  %v815_v19 = vpop.eup %814  ;;  %vm540_vm8 = vweird.f32 %v512_v15 }
 0x16d   : > { %v519_v20 = vmul.f32 %v813_v3, %v518_v17  ;;  %v525_v23 = vmul.f32 %v815_v19, %v511_v7  ;;  %vm531_vm5 = vweird.f32 %v815_v19 }
 0x16e   : > { %v509_v24 = vmax.f32 %v505_v18, 0.0  ;;  %vm532_vm6 = vmor %vm530_vm4, %vm531_vm5 }
 0x16f   : > { %v523_v25 = vsel %vm522_vm3, %v813_v3, %v519_v20  ;;  %v526_v29 = vmul.f32 %v815_v19, %v525_v23 }
 0x170   : > { %v560_v28 = vmul.f32 %v556_v21, %v523_v25  ;;  %v513_v30 = vadd.f32 1e-05, %v509_v24 }
 0x171   : > { %v527_v34 = vmul.f32 0.5, %v526_v29 }
 0x172   : > { %v817_v31 = vpop.eup %816  ;;  %v567_v33 = vmul.f32 %v810_v22, %v560_v28  ;;  %818 = vrsqrt.f32 %v513_v30  ;;  %vm550_vm11 = vweird.f32 %v513_v30 }
 0x173   : > { %v535_v26 = vmul.f32 %v817_v31, %v512_v15  ;;  %v528_v37 = vsub.f32 1.5, %v527_v34  ;;  %vm541_vm7 = vweird.f32 %v817_v31 }
 0x174   : > { %v574_v36 = vadd.f32 %v811_v27, %v567_v33  ;;  %vm542_vm9 = vmor %vm540_vm8, %vm541_vm7 }
 0x175   : > { %v536_v38 = vmul.f32 %v817_v31, %v535_v26  ;;  %v529_v39 = vmul.f32 %v815_v19, %v528_v37 }
 0x176   : > { %578 = vst.msk [vmem:[%s1228_s7] sm:$0xff] %vm379_vm0, %v574_v36 }
 0x177   : > { %v537_v41 = vmul.f32 0.5, %v536_v38  ;;  %v533_v44 = vsel %vm532_vm6, %v815_v19, %v529_v39 }
 0x178   : > { %v819_v43 = vpop.eup %818  ;;  %v561_v45 = vmul.f32 %v557_v40, %v533_v44 }
 0x179   : > { %v538_v46 = vsub.f32 1.5, %v537_v41  ;;  %v545_v47 = vmul.f32 %v819_v43, %v513_v30  ;;  %vm551_vm10 = vweird.f32 %v819_v43 }
 0x17a   : > { %v568_v48 = vmul.f32 %v810_v22, %v561_v45  ;;  %vm552_vm12 = vmor %vm550_vm11, %vm551_vm10 }
 0x17b   : > { %v539_v49 = vmul.f32 %v817_v31, %v538_v46  ;;  %v546_v50 = vmul.f32 %v819_v43, %v545_v47 }
 0x17c   : > { %v575_v52 = vadd.f32 %v811_v27, %v568_v48 }
 0x17d   : > { %v543_v35 = vsel %vm542_vm9, %v817_v31, %v539_v49  ;;  %v547_v53 = vmul.f32 0.5, %v546_v50 }
 0x17e   : > { %v562_v54 = vmul.f32 %v558_v51, %v543_v35  ;;  %579 = vst.msk [vmem:[%s1228_s7 + $0x8] sm:$0xff] %vm379_vm0, %v575_v52 }
 0x17f   : > { %v548_v55 = vsub.f32 1.5, %v547_v53 }
 0x180   : > { %v569_v56 = vmul.f32 %v810_v22, %v562_v54 }
 0x181   : > { %v549_v57 = vmul.f32 %v819_v43, %v548_v55 }
 0x182   : > { %v576_v59 = vadd.f32 %v811_v27, %v569_v56 }
 0x183   : > { %v553_v32 = vsel %vm552_vm12, %v819_v43, %v549_v57 }
 0x184   : > { %580 = vst.msk [vmem:[%s1228_s7 + $0x10] sm:$0xff] %vm379_vm0, %v576_v59  ;;  %v563_v60 = vmul.f32 %v559_v58, %v553_v32 }
 0x186   : > { %v570_v61 = vmul.f32 %v810_v22, %v563_v60 }
 0x188   : > { %v577_v62 = vadd.f32 %v811_v27, %v570_v61 }
 0x18a   : > { %581 = vst.msk [vmem:[%s1228_s7 + $0x18] sm:$0xff] %vm379_vm0, %v577_v62 }
 0x18b PF: > { %p20_p4 = scmp.ge.s32.totalorder %s1080_s16, 6   ;;  %s1279_s21 = smov %s978_s22 }
 0x18c   : > { %s1280_s22 = smov %s982_s23  ;;  %s1281_s23 = smov %s1091_s20 }
 0x18d   : > { %s1282_s24 = smov %s1080_s16  ;;  %22 = sbr.rel (!%p20_p4) target bundleno = 10 (0xa), region = 105 }
 0x192   :  { %604 = vsyncpa [#allocation3], 1 }
 0x193   :  { %606 = vsyncpa [#allocation3 + $0x1], 1 }
 0x194   :  { %607 = vsyncpa [#allocation5], 1 }
 0x195   :  { %609 = vsyncpa [#allocation5 + $0x1], 1 }
 0x196   :  { %610 = vsyncpa [#allocation8], 1 }

</bundles_post_ra>
